<compile_context>
chip_gen: v7x
topology: tpu7x:2x2x1
jax: 0.10.0
libtpu: 0.0.40
codegen_flags: <defaults>
</compile_context>

<pallas_src>
import functools

import jax
import jax.numpy as jnp
from jax.experimental import pallas as pl
from jax.experimental.pallas import tpu as pltpu

HIDDEN = 128  # fixed by the module (nn.Conv1d(in_channels, 128, 1))


def _round_up(a: int, b: int) -> int:
    return ((a + b - 1) // b) * b


def _embedder_kernel(x_ref, w1_ref, b1_ref, w2_ref, b2_ref, o_ref):
    # x_ref: (TM, E) f32, w1_ref: (E, 128), b1_ref: (1, 128) f32
    # w2_ref: (128, H), b2_ref: (1, H) f32, o_ref: (TM, H)
    # Cast x to the weight dtype in VMEM (cheap VPU pass, no extra HBM traffic);
    # both matmuls accumulate in f32 on the MXU.
    x = x_ref[...].astype(w1_ref.dtype)
    h = jnp.dot(x, w1_ref[...], preferred_element_type=jnp.float32) + b1_ref[...]
    h = jnp.maximum(h, 0.0)                      # ReLU after conv1d_1
    h = h.astype(w2_ref.dtype)                   # bf16 for the second MXU pass
    o = jnp.dot(h, w2_ref[...], preferred_element_type=jnp.float32) + b2_ref[...]
    o = jnp.maximum(o, 0.0)                      # ReLU after conv1d_4
    o_ref[...] = o.astype(o_ref.dtype)           # single cast at the store


@functools.partial(jax.jit, static_argnames=("tm", "use_bf16", "out_dtype"))
def conv1d_embedder(x, w1, b1, w2, b2, *, tm=8192, use_bf16=True, out_dtype=None):
    """x: (N, S, E) -> (N, S, H). Kernel-size-1 convs == pointwise matmuls.

    out_dtype: dtype of the stored result.  Defaults to bf16 when use_bf16 is
    True (halves HBM write traffic for the downstream bf16 transformer) and to
    x.dtype otherwise (bit-exact f32 path).
    """
    N, S, E = x.shape
    H = w2.shape[0]

    compute_dtype = jnp.bfloat16 if use_bf16 else jnp.float32
    if out_dtype is None:
        out_dtype = compute_dtype if use_bf16 else x.dtype

    # Flatten positions into rows; the pointwise conv is independent per (n, s).
    M = N * S
    x2 = x.reshape(M, E)

    # Conv weights (out_ch, in_ch, 1) -> matmul operands (in_ch, out_ch).
    w1_t = w1[:, :, 0].T.astype(compute_dtype)          # (E, 128)
    w2_t = w2[:, :, 0].T.astype(compute_dtype)          # (128, H)
    b1_r = b1.reshape(1, HIDDEN).astype(jnp.float32)
    b2_r = b2.reshape(1, H).astype(jnp.float32)

    # M tile: big (amortizes ~0.35us per grid step) but clamped so the grid
    # keeps >= ~8 steps -> pipeline stays double-buffered and the "parallel"
    # axis can shard across both TensorCores on v7x.  VMEM per step at
    # tm=8192: x ~1 MiB f32 + out ~1-2 MiB, x2 buffers -> well under 32 MiB.
    min_steps = 8
    tm_cap = _round_up(pl.cdiv(M, min_steps), 8)        # tile giving ~min_steps
    tm_eff = max(8, min((tm // 8) * 8, tm_cap))
    if M < tm_eff:
        tm_eff = M                                      # full dim: always legal
    grid = (pl.cdiv(M, tm_eff),)                        # ragged last block OK

    in_itemsize = jnp.dtype(x.dtype).itemsize
    out_itemsize = jnp.dtype(out_dtype).itemsize
    w_itemsize = jnp.dtype(compute_dtype).itemsize
    cost = pl.CostEstimate(
        flops=2 * M * (E * HIDDEN + HIDDEN * H),
        transcendentals=0,
        bytes_accessed=(M * E * in_itemsize                 # read x
                        + M * H * out_itemsize              # write out
                        + (w1_t.size + w2_t.size) * w_itemsize
                        + (b1_r.size + b2_r.size) * 4),
    )

    out = pl.pallas_call(
        _embedder_kernel,
        out_shape=jax.ShapeDtypeStruct((M, H), out_dtype),
        grid_spec=pltpu.PrefetchScalarGridSpec(
            num_scalar_prefetch=0,
            grid=grid,
            in_specs=[
                pl.BlockSpec((tm_eff, E), lambda i: (i, 0)),
                pl.BlockSpec((E, HIDDEN), lambda i: (0, 0)),   # resident
                pl.BlockSpec((1, HIDDEN), lambda i: (0, 0)),   # resident
                pl.BlockSpec((HIDDEN, H), lambda i: (0, 0)),   # resident
                pl.BlockSpec((1, H), lambda i: (0, 0)),        # resident
            ],
            # True-H output block: last dim equals the full array dim -> legal
            # even though H < 128; avoids padded lanes + wrapper slice.
            out_specs=pl.BlockSpec((tm_eff, H), lambda i: (i, 0)),
        ),
        compiler_params=pltpu.CompilerParams(
            dimension_semantics=("parallel",),       # megacore-shardable on v7x
            vmem_limit_bytes=32 * 1024 * 1024,       # safe on v5e/v6e/v7x
        ),
        cost_estimate=cost,
    )(x2, w1_t, b1_r, w2_t, b2_r)

    return out.reshape(N, S, H)


def _reference(x, w1, b1, w2, b2):
    # Pure-JAX f32 reference mirroring the PyTorch forward.
    h = jnp.einsum("nse,he->nsh", x, w1[:, :, 0]) + b1[None, None, :]
    h = jnp.maximum(h, 0.0)
    o = jnp.einsum("nsh,oh->nso", h, w2[:, :, 0]) + b2[None, None, :]
    return jnp.maximum(o, 0.0)


if __name__ == "__main__":
    # Small shapes consistent with the module's forward: (N, S, E) -> (N, S, H)
    # E = in_features (keypoints * coords), H = d_model (default 64).
    N, S, E, H = 2, 8, 32, 64

    key = jax.random.PRNGKey(0)
    kx, k1, kb1, k2, kb2 = jax.random.split(key, 5)

    x = jax.random.normal(kx, (N, S, E), dtype=jnp.float32)

    # Deterministic parameter init, PyTorch Conv1d-style uniform bounds.
    bound1 = 1.0 / (E ** 0.5)
    w1 = jax.random.uniform(k1, (HIDDEN, E, 1), jnp.float32, -bound1, bound1)
    b1 = jax.random.uniform(kb1, (HIDDEN,), jnp.float32, -bound1, bound1)
    bound2 = 1.0 / (HIDDEN ** 0.5)
    w2 = jax.random.uniform(k2, (H, HIDDEN, 1), jnp.float32, -bound2, bound2)
    b2 = jax.random.uniform(kb2, (H,), jnp.float32, -bound2, bound2)

    ref = _reference(x, w1, b1, w2, b2)

    # Exact f32 path (matches the PyTorch module up to MXU rounding).
    out_f32 = jax.block_until_ready(conv1d_embedder(x, w1, b1, w2, b2, use_bf16=False))
    assert out_f32.shape == (N, S, H), out_f32.shape
    assert out_f32.dtype == jnp.float32, out_f32.dtype
    assert jnp.allclose(out_f32, ref, atol=1e-5, rtol=1e-5), "f32 mismatch vs reference"

    # Fast bf16-MXU / bf16-store path (default): relaxed tolerance vs f32 ref.
    out_bf16 = jax.block_until_ready(conv1d_embedder(x, w1, b1, w2, b2, use_bf16=True))
    assert out_bf16.shape == (N, S, H), out_bf16.shape
    assert out_bf16.dtype == jnp.bfloat16, out_bf16.dtype
    assert jnp.allclose(out_bf16.astype(jnp.float32), ref, atol=3e-2, rtol=3e-2), \
        "bf16 mismatch vs reference"

    # Ragged-M case (M = 3*37 = 111 not a multiple of the tile): exercises the
    # masked last grid block on the true-H output path.
    N2, S2 = 3, 37
    x_r = jax.random.normal(jax.random.PRNGKey(1), (N2, S2, E), dtype=jnp.float32)
    ref_r = _reference(x_r, w1, b1, w2, b2)
    out_r = jax.block_until_ready(conv1d_embedder(x_r, w1, b1, w2, b2, use_bf16=True))
    assert out_r.shape == (N2, S2, H), out_r.shape
    assert jnp.allclose(out_r.astype(jnp.float32), ref_r, atol=3e-2, rtol=3e-2), \
        "ragged bf16 mismatch vs reference"

    print("KERNEL_OK")
</pallas_src>

<mosaic_0001>
module attributes {stable_mosaic.version = 11 : i64} {
  func.func @_embedder_kernel(%arg0: i32, %arg1: memref<8x32xf32, #tpu.memory_space<vmem>>, %arg2: memref<32x128xf32, #tpu.memory_space<vmem>>, %arg3: memref<1x128xf32, #tpu.memory_space<vmem>>, %arg4: memref<128x64xf32, #tpu.memory_space<vmem>>, %arg5: memref<1x64xf32, #tpu.memory_space<vmem>>, %arg6: memref<8x64xf32, #tpu.memory_space<vmem>>) attributes {dimension_semantics = [#tpu.dimension_semantics<parallel>], iteration_bounds = array<i64: 2>, scalar_prefetch = 0 : i64, scratch_operands = 0 : i64, tpu.core_type = #tpu.core_type<tc>, window_params = [{transform_indices = @transform_0, window_bounds = array<i64: 8, 32>}, {pipeline_mode = #tpu.pipeline_mode<synchronous>, transform_indices = @transform_1, window_bounds = array<i64: 32, 128>}, {pipeline_mode = #tpu.pipeline_mode<synchronous>, transform_indices = @transform_2, window_bounds = array<i64: 1, 128>}, {pipeline_mode = #tpu.pipeline_mode<synchronous>, transform_indices = @transform_3, window_bounds = array<i64: 128, 64>}, {pipeline_mode = #tpu.pipeline_mode<synchronous>, transform_indices = @transform_4, window_bounds = array<i64: 1, 64>}, {transform_indices = @transform_5, window_bounds = array<i64: 8, 64>}]} {
    %c0 = arith.constant 0 : index
    %c0_0 = arith.constant 0 : index
    %0 = vector.load %arg1[%c0, %c0_0] : memref<8x32xf32, #tpu.memory_space<vmem>>, vector<8x32xf32>
    %c0_1 = arith.constant 0 : index
    %c0_2 = arith.constant 0 : index
    %1 = vector.load %arg2[%c0_1, %c0_2] : memref<32x128xf32, #tpu.memory_space<vmem>>, vector<32x128xf32>
    %cst = arith.constant dense<0.000000e+00> : vector<8x128xf32>
    %2 = tpu.matmul %0, %1, %cst {dimension_numbers = #tpu.dot_dimension_numbers<[1], [0], [0], [1], [0, 0, 1, 1], [], []>} : vector<8x32xf32>, vector<32x128xf32>, vector<8x128xf32> -> vector<8x128xf32>
    %c0_3 = arith.constant 0 : index
    %c0_4 = arith.constant 0 : index
    %3 = vector.load %arg3[%c0_3, %c0_4] : memref<1x128xf32, #tpu.memory_space<vmem>>, vector<1x128xf32>
    %4 = vector.broadcast %3 : vector<1x128xf32> to vector<8x128xf32>
    %5 = arith.addf %2, %4 : vector<8x128xf32>
    %cst_5 = arith.constant 0.000000e+00 : f32
    %6 = vector.broadcast %cst_5 : f32 to vector<8x128xf32>
    %7 = arith.maximumf %5, %6 : vector<8x128xf32>
    %c0_6 = arith.constant 0 : index
    %c0_7 = arith.constant 0 : index
    %8 = vector.load %arg4[%c0_6, %c0_7] : memref<128x64xf32, #tpu.memory_space<vmem>>, vector<128x64xf32>
    %cst_8 = arith.constant dense<0.000000e+00> : vector<8x64xf32>
    %9 = tpu.matmul %7, %8, %cst_8 {dimension_numbers = #tpu.dot_dimension_numbers<[1], [0], [0], [1], [0, 0, 1, 1], [], []>} : vector<8x128xf32>, vector<128x64xf32>, vector<8x64xf32> -> vector<8x64xf32>
    %c0_9 = arith.constant 0 : index
    %c0_10 = arith.constant 0 : index
    %10 = vector.load %arg5[%c0_9, %c0_10] : memref<1x64xf32, #tpu.memory_space<vmem>>, vector<1x64xf32>
    %11 = vector.broadcast %10 : vector<1x64xf32> to vector<8x64xf32>
    %12 = arith.addf %9, %11 : vector<8x64xf32>
    %cst_11 = arith.constant 0.000000e+00 : f32
    %13 = vector.broadcast %cst_11 : f32 to vector<8x64xf32>
    %14 = arith.maximumf %12, %13 : vector<8x64xf32>
    %c0_12 = arith.constant 0 : index
    %c0_13 = arith.constant 0 : index
    %15 = vector.load %arg6[%c0_12, %c0_13] : memref<8x64xf32, #tpu.memory_space<vmem>>, vector<8x64xf32>
    tpu.vector_store %arg6[%c0_12, %c0_13], %14 {strides = array<i32>} : memref<8x64xf32, #tpu.memory_space<vmem>>, vector<8x64xf32>,
    return
  }
  func.func @transform_0(%arg0: i32) -> (i32, i32) {
    %c0_i32 = arith.constant 0 : i32
    %c0_i32_0 = arith.constant 0 : i32
    return %arg0, %c0_i32 : i32, i32
  }
  func.func @transform_1(%arg0: i32) -> (i32, i32) {
    %c0_i32 = arith.constant 0 : i32
    %c0_i32_0 = arith.constant 0 : i32
    %c0_i32_1 = arith.constant 0 : i32
    return %c0_i32, %c0_i32_0 : i32, i32
  }
  func.func @transform_2(%arg0: i32) -> (i32, i32) {
    %c0_i32 = arith.constant 0 : i32
    %c0_i32_0 = arith.constant 0 : i32
    %c0_i32_1 = arith.constant 0 : i32
    return %c0_i32, %c0_i32_0 : i32, i32
  }
  func.func @transform_3(%arg0: i32) -> (i32, i32) {
    %c0_i32 = arith.constant 0 : i32
    %c0_i32_0 = arith.constant 0 : i32
    %c0_i32_1 = arith.constant 0 : i32
    return %c0_i32, %c0_i32_0 : i32, i32
  }
  func.func @transform_4(%arg0: i32) -> (i32, i32) {
    %c0_i32 = arith.constant 0 : i32
    %c0_i32_0 = arith.constant 0 : i32
    %c0_i32_1 = arith.constant 0 : i32
    return %c0_i32, %c0_i32_0 : i32, i32
  }
  func.func @transform_5(%arg0: i32) -> (i32, i32) {
    %c0_i32 = arith.constant 0 : i32
    %c0_i32_0 = arith.constant 0 : i32
    return %arg0, %c0_i32 : i32, i32
  }
}

</mosaic_0001>

<bundles_post_ra>
// kernel: conv1d_embedder.1
= control target key start
LH: loop header
LB: loop body
LE: loop exit
PB: predicated region body
PF: predicated region fallthrough
CT: control target
= control target key end

     0   :  { %10 = vsyncpa [#allocation3], 0  ;;  %s893_s0 = inlined_call_operand.vmem [shape: f32[16,32], index: 0, kind: input, shape index: {}]   ;;  %s894_s1 = inlined_call_operand.vmem [shape: f32[32,128], index: 1, kind: input, shape index: {}]   ;;  %s895_s2 = inlined_call_operand.vmem [shape: f32[1,128], index: 2, kind: input, shape index: {}]   ;;  %s896_s3 = inlined_call_operand.vmem [shape: f32[128,64], index: 3, kind: input, shape index: {}]   ;;  %s897_s4 = inlined_call_operand.vmem [shape: f32[1,64], index: 4, kind: input, shape index: {}]   ;;  %s898_s5 = inlined_call_operand.hbm [shape: f32[16,64], index: 5, kind: output, shape index: {}]  }
   0x1   :  { %12 = vsyncpa [#allocation3 + $0x1], 0  ;;  %s727_s18 = smov 0   ;;  %s729_s19 = smov 0  }
   0x2   :  { %s731_s20 = smov 0   ;;  %s733_s21 = smov 0  }
   0x3 LB: > { %s748_s22 = sadd.s32 4294967295, %s691_s21   ;;  %s476_s23 = sadd.s32 4294967294, %s691_s21   ;;  %s691_s21 = sphi %s733_s21, %s904_s21   ;;  %s687_s20 = sphi %s731_s20, %s903_s20   ;;  %s683_s19 = sphi %s729_s19, %s902_s19   ;;  %s679_s18 = sphi %s727_s18, %s901_s18  }
   0x4   : > { %s752_s24 = sadd.s32 1, %s691_s21   ;;  %s135_s25 = sadd.s32 1, %s687_s20 }
   0x5   : > { %s132_s26 = ssub.s32 %s691_s21, %s752_s24  ;;  %p145_p0 = scmp.ne.s32.totalorder %s687_s20, %s683_s19 }
   0x6   : > { %p133_p1 = scmp.eq.s32.totalorder %s132_s26, 0  ;;  %p146_p2 = scmp.eq.s32.totalorder %s748_s22, 1 }
   0x7   : > { %p151_p3 = scmp.ne.s32.totalorder %s683_s19, %s679_s18  ;;  %p152_p4 = scmp.eq.s32.totalorder %s476_s23, 1 }
   0x8   : > { %s763_s27 = scalar_select %p133_p1, %s687_s20, %s135_s25  }
   0x9   : > { %p765_p5 = por %p146_p2, %p145_p0  ;;  %p769_p6 = por %p152_p4, %p151_p3 }
   0xa   : > { %p479_p7 = scmp.ge.s32.totalorder %s691_s21, 1  ;;  %p189_p8 = scmp.lt.s32.totalorder %s691_s21, 3 }
   0xc   : > { %p190_p9 = pnand %p479_p7, %p189_p8 }
   0xd   : > { %v221_v0 = vld [vmem:[%s894_s1] sm:$0xff] (!%p190_p9)  ;;  %v222_v1 = vld [vmem:[%s894_s1 + $0x8] sm:$0xff] (!%p190_p9)  ;;  %v223_v2 = vld [vmem:[%s894_s1 + $0x10] sm:$0xff] (!%p190_p9)  ;;  %v693_v3 = vmov (!%p190_p9), 0.0|0.0   ;;  %vm694_vm0 = vmmov (!%p190_p9), 0   ;;  %v695_v6 = vmov (!%p190_p9), 0.0  }
   0xe   : > { %193 = sbr.rel (%p190_p9) target bundleno = 472 (0x1d8), region = 40  ;;  %557 = vmatprep.subr.bf16.mxu0 (!%p190_p9), %v693_v3  ;;  %v558_v4 = vpack.c.bf16 (!%p190_p9), %v222_v1, %v221_v0  ;;  %v224_v5 = vld [vmem:[%s894_s1 + $0x18] sm:$0xff] (!%p190_p9)  ;;  %519 = vmatprep.mubr.msk.f32.mxu0 (!%p190_p9), %vm694_vm0, %v695_v6  ;;  %p216_p10 = scmp.lt.s32.totalorder (!%p190_p9), %s748_s22, 1  ;;  %v307_v7 = vld [vmem:[%s896_s3] sm:$0xff] (!%p190_p9)  ;;  %v308_v8 = vld [vmem:[%s896_s3 + $0x8] sm:$0xff] (!%p190_p9)  ;;  %vm232_vm1 = vcmask (!%p190_p9), 261120  }
   0xf   : > { %563 = vmatprep.subr.bf16.mxu1 (!%p190_p9), %v693_v3  ;;  %v564_v9 = vpack.c.bf16 (!%p190_p9), %v308_v8, %v307_v7  ;;  %v309_v10 = vld [vmem:[%s896_s3 + $0x10] sm:$0xff] (!%p190_p9)  ;;  %v310_v11 = vld [vmem:[%s896_s3 + $0x18] sm:$0xff] (!%p190_p9)  ;;  %554 = vmatprep.mubr.msk.f32.mxu1 (!%p190_p9), %vm694_vm0, %v695_v6  ;;  %v561_v12 = vpack.c.bf16 (!%p190_p9), %v224_v5, %v223_v2  ;;  %v311_v14 = vld [vmem:[%s896_s3 + $0x20] sm:$0xff] (!%p190_p9)  ;;  %s213_s26 = sand.u32 (!%p190_p9), 1, %s683_s19   ;;  %s486_s8 = sshll.u32 (!%p190_p9), %s748_s22, 7  ;;  %vm401_vm2 = vcmask (!%p190_p9), 523264  }
  0x10   : > { %559 = vmatpush3.bf16.msra.mxu0 (!%p190_p9), %v558_v4  ;;  %v567_v13 = vpack.c.bf16 (!%p190_p9), %v310_v11, %v309_v10  ;;  %v312_v15 = vld [vmem:[%s896_s3 + $0x28] sm:$0xff] (!%p190_p9)  ;;  %v313_v18 = vld [vmem:[%s896_s3 + $0x30] sm:$0xff] (!%p190_p9)  ;;  %v314_v19 = vld [vmem:[%s896_s3 + $0x38] sm:$0xff] (!%p190_p9)  ;;  %s404_s14 = scalar_lea.sflag (!%p190_p9), [#allocation3], %s213_s26 }
  0x11   : > { %560 = vmatprep.subr.bf16.mxu0 (!%p190_p9), %v693_v3  ;;  %565 = vmatpush3.bf16.msra.mxu1 (!%p190_p9), %v564_v9  ;;  %v570_v17 = vpack.c.bf16 (!%p190_p9), %v312_v15, %v311_v14  ;;  %v573_v20 = vpack.c.bf16 (!%p190_p9), %v314_v19, %v313_v18  ;;  %v315_v21 = vld [vmem:[%s896_s3 + $0x40] sm:$0xff] (!%p190_p9)  ;;  %v316_v22 = vld [vmem:[%s896_s3 + $0x48] sm:$0xff] (!%p190_p9)  ;;  %v317_v24 = vld [vmem:[%s896_s3 + $0x50] sm:$0xff] (!%p190_p9) }
  0x12   : > { %566 = vmatprep.subr.bf16.mxu1 (!%p190_p9), %v693_v3  ;;  %v576_v23 = vpack.c.bf16 (!%p190_p9), %v316_v22, %v315_v21  ;;  %v318_v25 = vld [vmem:[%s896_s3 + $0x58] sm:$0xff] (!%p190_p9)  ;;  %v319_v27 = vld [vmem:[%s896_s3 + $0x60] sm:$0xff] (!%p190_p9)  ;;  %v320_v28 = vld [vmem:[%s896_s3 + $0x68] sm:$0xff] (!%p190_p9) }
  0x13   : > { %v579_v26 = vpack.c.bf16 (!%p190_p9), %v318_v25, %v317_v24  ;;  %v582_v29 = vpack.c.bf16 (!%p190_p9), %v320_v28, %v319_v27  ;;  %v321_v30 = vld [vmem:[%s896_s3 + $0x70] sm:$0xff] (!%p190_p9)  ;;  %v322_v31 = vld [vmem:[%s896_s3 + $0x78] sm:$0xff] (!%p190_p9)  ;;  %v482_v33 = vld [vmem:[%s895_s2] ss:$0 sm:$0xff] (!%p190_p9) }
  0x14   : > { %562 = vmatpush3.bf16.msra.mxu0 (!%p190_p9), %v561_v12  ;;  %v585_v32 = vpack.c.bf16 (!%p190_p9), %v322_v31, %v321_v30  ;;  %v484_v38 = vld [vmem:[%s897_s4] ss:$0 sm:$0xff] (!%p190_p9) }
  0x15   : > { %s217_s30 = scalar_select %p216_p10, %s748_s22, 1  ;;  %568 = vmatpush3.bf16.msra.mxu1 %v567_v13 }
  0x16   : > { %569 = vmatprep.subr.bf16.mxu1 %v693_v3  ;;  %s696_s22 = smov [#allocation2]  }
  0x17   : > { %s481_s6 = sshll.u32 %s217_s30, 3  ;;  %s480_s30 = sshll.u32 %s213_s26, 3 }
  0x18   : > { %s219_s13 = scalar_lea.vmem %s893_s0, %s481_s6  ;;  %s215_s9 = scalar_lea.vmem [#allocation2], %s480_s30 }
  0x19   : > { %v220_v16 = vld [vmem:[%s219_s13] sm:$0xff]  ;;  %571 = vmatpush3.bf16.msra.mxu1 %v570_v17  ;;  %s417_s10 = sshll.u32 %s215_s9, 4  ;;  %s851_s13 = scalar_lea.hbm %s898_s5, %s486_s8  ;;  %s853_s10 = int_to_ptr.vmem [resolvable:$true] %s417_s10 }
  0x1a   : > { %520 = vmatmul.mubr.msk.f32.vlgmr.msra.gmra.mrb[0].mxu0 %vm232_vm1, %v220_v16  ;;  %572 = vmatprep.subr.bf16.mxu1 %v693_v3  ;;  %s629_s15 = scalar_lea.vmem %s853_s10, 128  ;;  %s633_s16 = sshll.u32 %s696_s22, 4  ;;  %s634_s16 = int_to_ptr.vmem [resolvable:$false] %s633_s16 }
  0x1b   : > { %p630_p11 = scmp.ne.s32.totalorder %s853_s10, %s629_s15  ;;  %s635_s17 = scalar_lea.vmem %s634_s16, 256 }
  0x1c   : > { %p636_p0 = scmp.lt.s32.totalorder %s853_s10, %s634_s16  ;;  %p637_p1 = scmp.lt.s32.totalorder %s635_s17, %s629_s15 }
  0x1d   : > { %574 = vmatpush3.bf16.msra.mxu1 %v573_v20  ;;  %p631_p12 = pnand %p630_p11, %p765_p5 }
  0x1e   : > { %575 = vmatprep.subr.bf16.mxu1 %v693_v3  ;;  %p638_p2 = por %p637_p1, %p636_p0 }
  0x1f   : > { %p632_p13 = pneg %p631_p12 }
  0x21   : > { %577 = vmatpush3.bf16.msra.mxu1 %v576_v23  ;;  %p639_p3 = pnand %p638_p2, %p632_p13 }
  0x22   : > { %578 = vmatprep.subr.bf16.mxu1 %v693_v3 }
  0x25   : > { %580 = vmatpush3.bf16.msra.mxu1 %v579_v26 }
  0x26   : > { %581 = vmatprep.subr.bf16.mxu1 %v693_v3 }
  0x29   : > { %583 = vmatpush3.bf16.msra.mxu1 %v582_v29 }
  0x2a   : > { %584 = vmatprep.subr.bf16.mxu1 %v693_v3 }
  0x2d   : > { %586 = vmatpush3.bf16.msra.mxu1 %v585_v32 }
  0xed   : > { %v302_v34 = vpop.f32.mrb[0].mxu0 }
  0xee   : > { %v303_v35 = vadd.f32 %v482_v33, %v302_v34  ;;  %v521_v36 = vpop.f32.mrb[1].mxu0 }
  0xf0   : > { %v306_v37 = vmax.f32 %v303_v35, 0.0 }
  0xf2   : > { %555 = vmatmul.mubr.f32.vlgmr.msra.gmra.mrb[0].mxu1 %v306_v37 }
 0x1c5   : > { %v396_v39 = vpop.f32.mrb[0].mxu1 }
 0x1c6   : > { %v397_v40 = vadd.f32 %v484_v38, %v396_v39  ;;  %v556_v41 = vpop.f32.mrb[1].mxu1 }
 0x1c8   : > { %v400_v42 = vmax.f32 %v397_v40, 0.0 }
 0x1ca   : > { %402 = vst.msk [vmem:[%s215_s9] sm:$0xff] %vm401_vm2, %v400_v42 }
 0x1cb   : > { %642 = shalt.err (!%p639_p3)
}
 0x1cc   : > { %s643_s23 = scalar_lea.hbm %s851_s13, 128  ;;  %s647_s30 = scalar_lea.hbm %s898_s5, 256 }
 0x1cd   : > { %p644_p4 = scmp.ne.s32.totalorder %s851_s13, %s643_s23  ;;  %p648_p9 = scmp.lt.u32.totalorder %s851_s13, %s898_s5 }
 0x1ce   : > { %p649_p10 = scmp.lt.u32.totalorder %s647_s30, %s643_s23  ;;  %p651_p12 = scmp.lt.u32.totalorder %s643_s23, %s851_s13 }
 0x1cf   : > { %p645_p7 = pnand %p644_p4, %p765_p5 }
 0x1d0   : > { %p650_p11 = por %p649_p10, %p648_p9 }
 0x1d1   : > { %p646_p8 = pneg %p645_p7 }
 0x1d2   : > { %p652_p13 = por %p651_p12, %p650_p11 }
 0x1d4   : > { %p653_p0 = pnand %p652_p13, %p646_p8 }
 0x1d6   : > { %656 = shalt.err (!%p653_p0)
}
 0x1d7   : > { %587 = dma.vmem_to_hbm [thread:$0]  (%p765_p5), %s853_s10, 128, %s851_s13, %s404_s14  }
 0x1d8 PF: > { %p593_p1 = scmp.ge.s32.totalorder %s691_s21, 2  ;;  %s429_s8 = sand.u32 1, %s679_s18  }
 0x1d9   : > { %s430_s9 = scalar_lea.sflag [#allocation3], %s429_s8 }
 0x1da   : > { %p590_p2 = pnand %p593_p1, %p769_p6 }
 0x1dc   : > { %674 = dma.done.wait (!%p590_p2), %s430_s9, 128  }
 0x1dd   : > { %676 = vsyncadd (!%p590_p2), %s430_s9, 4294967168  ;;  %p15_p3 = scmp.ge.s32.totalorder %s752_s24, 4   ;;  %s901_s18 = smov %s683_s19 }
 0x1de   : > { %s902_s19 = smov %s687_s20  ;;  %s903_s20 = smov %s763_s27 }
 0x1df   : > { %s904_s21 = smov %s752_s24  ;;  %17 = sbr.rel (!%p15_p3) target bundleno = 3 (0x3), region = 75 }
 0x1e6   :  { %435 = vsyncpa [#allocation3], 1 }
 0x1e7   :  { %437 = vsyncpa [#allocation3 + $0x1], 1 }

</bundles_post_ra>
